<compile_context>
chip_gen: v5e
topology: v5e:2x2
jax: 0.10.0
libtpu: 0.0.40
codegen_flags: <defaults>
</compile_context>

<pallas_src>
import jax
import jax.numpy as jnp
from jax import lax
from jax.experimental import pallas as pl
from jax.experimental.pallas import tpu as pltpu


def _round_up(x, m):
    return ((x + m - 1) // m) * m


def _tile_plan(B, N):
    """Pick (tm, tn, B_pad, N_pad): sublane-aligned M tiles, lane-dense N tiles."""
    if B >= 256:
        tm = 256
    elif B >= 128:
        tm = 128
    else:
        tm = _round_up(max(B, 8), 16)      # small batch: one 16-aligned tile
    tn = 256 if N >= 256 else 128          # 256-aligned feeds v6e/v7x MXU fully
    return tm, tn, _round_up(B, tm), _round_up(N, tn)


def _relation_kernel(x_ref, w_ref, b_ref, o_ref):
    # x_ref: (tm, D) bf16   w_ref: (tn, D) bf16   b_ref: (1, tn) f32   o_ref: (tm, tn) f32
    x = jnp.maximum(x_ref[...], 0)                       # first ReLU (exact in bf16)
    # Contract on D with W in (out, in) layout -> (tm, tn), f32 accumulation on MXU.
    y = lax.dot_general(
        x, w_ref[...],
        dimension_numbers=(((1,), (1,)), ((), ())),
        preferred_element_type=jnp.float32,
    )
    y = y + b_ref[...]                                   # bias broadcast, f32
    o_ref[...] = jnp.maximum(y, 0.0).astype(o_ref.dtype)  # second ReLU


def relation_module_forward(x, weight, bias, num_frames, img_feature_dim):
    """x: (B, num_frames, img_feature_dim) f32.
    weight: (num_bottleneck, D) PyTorch-style (out, in). bias: (num_bottleneck,)."""
    B = x.shape[0]
    D = num_frames * img_feature_dim
    N = weight.shape[0]
    tm, tn, B_pad, N_pad = _tile_plan(B, N)

    # --- wrapper-side prep (in real use the weight cast/pad would be cached) ---
    x2d = x.reshape(B, D).astype(jnp.bfloat16)
    if B_pad != B:
        x2d = jnp.pad(x2d, ((0, B_pad - B), (0, 0)))
    w = weight.astype(jnp.bfloat16)                      # keep (N, D); no transpose
    if N_pad != N:
        w = jnp.pad(w, ((0, N_pad - N), (0, 0)))
    b2d = bias.astype(jnp.float32).reshape(1, N)
    if N_pad != N:
        b2d = jnp.pad(b2d, ((0, 0), (0, N_pad - N)))

    grid_n = N_pad // tn
    grid_m = B_pad // tm
    # Grid: N tiles outer (axis 0), M tiles inner (axis 1) -> weight tile is held
    # resident across the whole inner batch sweep.
    grid = (grid_n, grid_m)

    cost = pl.CostEstimate(
        flops=2 * B_pad * D * N_pad,
        transcendentals=0,
        bytes_accessed=(B_pad * D * 2) * grid_n   # x re-streamed once per N tile
        + N_pad * D * 2                           # weight read once
        + B_pad * N_pad * 4                       # output
        + N_pad * 4,                              # bias
    )

    out = pl.pallas_call(
        _relation_kernel,
        out_shape=jax.ShapeDtypeStruct((B_pad, N_pad), jnp.float32),
        grid_spec=pltpu.PrefetchScalarGridSpec(
            num_scalar_prefetch=0,
            grid=grid,
            in_specs=[
                pl.BlockSpec((tm, D), lambda j, i: (i, 0)),   # activations
                pl.BlockSpec((tn, D), lambda j, i: (j, 0)),   # weight: outer-axis only
                pl.BlockSpec((1, tn), lambda j, i: (0, j)),   # bias: outer-axis only
            ],
            out_specs=pl.BlockSpec((tm, tn), lambda j, i: (i, j)),
        ),
        compiler_params=pltpu.CompilerParams(
            dimension_semantics=("parallel", "parallel"),
        ),
        cost_estimate=cost,
    )(x2d, w, b2d)

    return out[:B, :N]


def _ref_forward(x, weight, bias, num_frames, img_feature_dim):
    B = x.shape[0]
    x2d = x.reshape(B, num_frames * img_feature_dim)
    h = jnp.maximum(x2d, 0.0)
    y = h @ weight.T + bias
    return jnp.maximum(y, 0.0)


if __name__ == "__main__":
    # Small shapes consistent with the module's forward.
    batch = 2
    num_frames = 8
    img_feature_dim = 32
    num_bottleneck = 64
    D = num_frames * img_feature_dim

    key = jax.random.PRNGKey(0)
    kx, kw, kb = jax.random.split(key, 3)

    x = jax.random.normal(kx, (batch, num_frames, img_feature_dim), dtype=jnp.float32)

    # PyTorch nn.Linear-shaped synthetic parameters: (out, in) / (out,).
    bound = 1.0 / (D ** 0.5)
    weight = jax.random.uniform(kw, (num_bottleneck, D), dtype=jnp.float32,
                                minval=-bound, maxval=bound)
    bias = jax.random.uniform(kb, (num_bottleneck,), dtype=jnp.float32,
                              minval=-bound, maxval=bound)

    out = relation_module_forward(x, weight, bias, num_frames, img_feature_dim)
    out = jax.block_until_ready(out)

    ref = _ref_forward(x, weight, bias, num_frames, img_feature_dim)
    assert out.shape == (batch, num_bottleneck)
    # bf16 matmul inputs with f32 accumulation -> relaxed tolerance vs f32 reference.
    assert jnp.allclose(out, ref, atol=2e-2, rtol=2e-2), "mismatch vs reference"

    print("KERNEL_OK")
</pallas_src>

<mosaic_0001>
module attributes {stable_mosaic.version = 11 : i64} {
  func.func @_relation_kernel(%arg0: i32, %arg1: i32, %arg2: memref<16x256xbf16, #tpu.memory_space<vmem>>, %arg3: memref<128x256xbf16, #tpu.memory_space<vmem>>, %arg4: memref<1x128xf32, #tpu.memory_space<vmem>>, %arg5: memref<16x128xf32, #tpu.memory_space<vmem>>) attributes {dimension_semantics = [#tpu.dimension_semantics<parallel>, #tpu.dimension_semantics<parallel>], iteration_bounds = array<i64: 1, 1>, scalar_prefetch = 0 : i64, scratch_operands = 0 : i64, tpu.core_type = #tpu.core_type<tc>, window_params = [{transform_indices = @transform_0, window_bounds = array<i64: 16, 256>}, {transform_indices = @transform_1, window_bounds = array<i64: 128, 256>}, {transform_indices = @transform_2, window_bounds = array<i64: 1, 128>}, {transform_indices = @transform_3, window_bounds = array<i64: 16, 128>}]} {
    %c0 = arith.constant 0 : index
    %c0_0 = arith.constant 0 : index
    %0 = vector.load %arg2[%c0, %c0_0] : memref<16x256xbf16, #tpu.memory_space<vmem>>, vector<16x256xbf16>
    %cst = arith.constant 0.000000e+00 : bf16
    %1 = vector.broadcast %cst : bf16 to vector<16x256xbf16>
    %2 = arith.maximumf %0, %1 : vector<16x256xbf16>
    %c0_1 = arith.constant 0 : index
    %c0_2 = arith.constant 0 : index
    %3 = vector.load %arg3[%c0_1, %c0_2] : memref<128x256xbf16, #tpu.memory_space<vmem>>, vector<128x256xbf16>
    %cst_3 = arith.constant dense<0.000000e+00> : vector<16x128xf32>
    %4 = tpu.matmul %2, %3, %cst_3 {dimension_numbers = #tpu.dot_dimension_numbers<[1], [1], [0], [0], [0, 0, 1, 0], [], []>} : vector<16x256xbf16>, vector<128x256xbf16>, vector<16x128xf32> -> vector<16x128xf32>
    %c0_4 = arith.constant 0 : index
    %c0_5 = arith.constant 0 : index
    %5 = vector.load %arg4[%c0_4, %c0_5] : memref<1x128xf32, #tpu.memory_space<vmem>>, vector<1x128xf32>
    %6 = vector.broadcast %5 : vector<1x128xf32> to vector<16x128xf32>
    %7 = arith.addf %4, %6 : vector<16x128xf32>
    %cst_6 = arith.constant 0.000000e+00 : f32
    %8 = vector.broadcast %cst_6 : f32 to vector<16x128xf32>
    %9 = arith.maximumf %7, %8 : vector<16x128xf32>
    %c0_7 = arith.constant 0 : index
    %c0_8 = arith.constant 0 : index
    %10 = vector.load %arg5[%c0_7, %c0_8] : memref<16x128xf32, #tpu.memory_space<vmem>>, vector<16x128xf32>
    tpu.vector_store %arg5[%c0_7, %c0_8], %9 {strides = array<i32>} : memref<16x128xf32, #tpu.memory_space<vmem>>, vector<16x128xf32>,
    return
  }
  func.func @transform_0(%arg0: i32, %arg1: i32) -> (i32, i32) {
    %c0_i32 = arith.constant 0 : i32
    %c0_i32_0 = arith.constant 0 : i32
    return %arg1, %c0_i32 : i32, i32
  }
  func.func @transform_1(%arg0: i32, %arg1: i32) -> (i32, i32) {
    %c0_i32 = arith.constant 0 : i32
    %c0_i32_0 = arith.constant 0 : i32
    return %arg0, %c0_i32 : i32, i32
  }
  func.func @transform_2(%arg0: i32, %arg1: i32) -> (i32, i32) {
    %c0_i32 = arith.constant 0 : i32
    %c0_i32_0 = arith.constant 0 : i32
    return %c0_i32, %arg0 : i32, i32
  }
  func.func @transform_3(%arg0: i32, %arg1: i32) -> (i32, i32) {
    %c0_i32 = arith.constant 0 : i32
    return %arg1, %arg0 : i32, i32
  }
}

</mosaic_0001>

<bundles_post_ra>
// kernel: tpu_custom_call.1
= control target key start
LH: loop header
LB: loop body
LE: loop exit
PB: predicated region body
PF: predicated region fallthrough
CT: control target
= control target key end

     0   :  { %8 = vsyncpa [#allocation3], 0  ;;  %s421_s0 = inlined_call_operand.hbm [shape: bf16[16,256], index: 0, kind: input, shape index: {}]   ;;  %s422_s1 = inlined_call_operand.hbm [shape: bf16[128,256], index: 1, kind: input, shape index: {}]   ;;  %s423_s2 = inlined_call_operand.vmem [shape: f32[1,128], index: 2, kind: input, shape index: {}]   ;;  %s424_s3 = inlined_call_operand.hbm [shape: f32[16,128], index: 3, kind: output, shape index: {}]  }
   0x1   :  { %9 = vsyncpa [#allocation6], 0 }
   0x2   :  { %10 = vsyncpa [#allocation4], 0  ;;  %s15_s14 = sshll.u32 %s421_s0, 4  ;;  %s375_s15 = smov [#allocation2]   ;;  %s16_s14 = int_to_ptr.hbm [resolvable:$true] %s15_s14 }
   0x3   :  { %s17_s16 = sshll.u32 %s375_s15, 4  ;;  %s28_s19 = sshll.u32 %s422_s1, 4  ;;  %s18_s16 = int_to_ptr.vmem [resolvable:$true] %s17_s16  ;;  %s29_s19 = int_to_ptr.hbm [resolvable:$true] %s28_s19 }
   0x4   :  { %s376_s20 = smov 128   ;;  %s377_s21 = smov 8  }
   0x5   :  { %23 = dma.hbm_to_vmem [thread:$0]  %s16_s14, 256, %s18_s16, [#allocation3], %s376_s20, %s376_s20, %s377_s21  }
   0x6   :  { %s378_s22 = smov [#allocation5]  }
   0x7   :  { %s30_s23 = sshll.u32 %s378_s22, 4  ;;  %s31_s23 = int_to_ptr.vmem [resolvable:$true] %s30_s23 }
   0x8   :  { %36 = dma.hbm_to_vmem [thread:$0]  %s29_s19, 2048, %s31_s23, [#allocation6], %s376_s20, %s376_s20, %s377_s21  }
   0x9   :  { %369 = dma.done.wait [#allocation3], 256  }
   0xa   :  { %370 = vsyncadd [#allocation3], 4294967040 }
   0xb   :  { %371 = dma.done.wait [#allocation6], 2048  }
   0xc   :  { %372 = vsyncadd [#allocation6], 4294965248  ;;  %v269_v0 = vld [vmem:[#allocation5 + $0x70] sm:$0xf]  ;;  %v290_v1 = vld [vmem:[#allocation5 + $0x74] sm:$0xf0] }
   0xd   :  { %v289_v2 = vld [vmem:[#allocation5 + $0x74] sm:$0xf]  ;;  %v270_v3 = vor.u32 %v290_v1, %v269_v0  ;;  %v271_v4 = vld [vmem:[#allocation5 + $0x78] sm:$0xf0]  ;;  %v261_v6 = vld [vmem:[#allocation5 + $0x60] sm:$0xf] }
   0xe   :  { %v274_v5 = vor.u32 %v289_v2, %v271_v4  ;;  %v288_v7 = vld [vmem:[#allocation5 + $0x64] sm:$0xf0]  ;;  %v287_v8 = vld [vmem:[#allocation5 + $0x64] sm:$0xf]  ;;  %v263_v9 = vld [vmem:[#allocation5 + $0x68] sm:$0xf0] }
   0xf   :  { %159 = vmatpush.bf16.xpose.msra.mxu0 %v270_v3  ;;  %v262_v10 = vor.u32 %v288_v7, %v261_v6  ;;  %v266_v11 = vor.u32 %v287_v8, %v263_v9  ;;  %v253_v12 = vld [vmem:[#allocation5 + $0x50] sm:$0xf]  ;;  %v286_v13 = vld [vmem:[#allocation5 + $0x54] sm:$0xf0]  ;;  %v285_v14 = vld [vmem:[#allocation5 + $0x54] sm:$0xf] }
  0x10   :  { %173 = vmatpush.bf16.xpose.msra.mxu1 %v274_v5  ;;  %v255_v15 = vld [vmem:[#allocation5 + $0x58] sm:$0xf0]  ;;  %v254_v16 = vor.u32 %v286_v13, %v253_v12  ;;  %v245_v18 = vld [vmem:[#allocation5 + $0x40] sm:$0xf]  ;;  %v284_v19 = vld [vmem:[#allocation5 + $0x44] sm:$0xf0] }
  0x11   :  { %v258_v17 = vor.u32 %v285_v14, %v255_v15  ;;  %v283_v20 = vld [vmem:[#allocation5 + $0x44] sm:$0xf]  ;;  %v247_v21 = vld [vmem:[#allocation5 + $0x48] sm:$0xf0]  ;;  %v246_v22 = vor.u32 %v284_v19, %v245_v18  ;;  %v237_v24 = vld [vmem:[#allocation5 + $0x30] sm:$0xf] }
  0x12   :  { %v250_v23 = vor.u32 %v283_v20, %v247_v21  ;;  %v282_v25 = vld [vmem:[#allocation5 + $0x34] sm:$0xf0]  ;;  %v281_v26 = vld [vmem:[#allocation5 + $0x34] sm:$0xf]  ;;  %v239_v27 = vld [vmem:[#allocation5 + $0x38] sm:$0xf0] }
  0x13   :  { %v238_v28 = vor.u32 %v282_v25, %v237_v24  ;;  %v242_v29 = vor.u32 %v281_v26, %v239_v27  ;;  %v229_v30 = vld [vmem:[#allocation5 + $0x20] sm:$0xf]  ;;  %v280_v31 = vld [vmem:[#allocation5 + $0x24] sm:$0xf0]  ;;  %v279_v32 = vld [vmem:[#allocation5 + $0x24] sm:$0xf] }
  0x14   :  { %v231_v33 = vld [vmem:[#allocation5 + $0x28] sm:$0xf0]  ;;  %v230_v34 = vor.u32 %v280_v31, %v229_v30  ;;  %v221_v36 = vld [vmem:[#allocation5 + $0x10] sm:$0xf]  ;;  %v278_v37 = vld [vmem:[#allocation5 + $0x14] sm:$0xf0] }
  0x15   :  { %v234_v35 = vor.u32 %v279_v32, %v231_v33  ;;  %v277_v38 = vld [vmem:[#allocation5 + $0x14] sm:$0xf]  ;;  %v223_v39 = vld [vmem:[#allocation5 + $0x18] sm:$0xf0]  ;;  %v222_v40 = vor.u32 %v278_v37, %v221_v36  ;;  %v213_v44 = vld [vmem:[#allocation5] sm:$0xf] }
  0x16   :  { %v226_v41 = vor.u32 %v277_v38, %v223_v39  ;;  %v47_v42 = vld [vmem:[#allocation2] sm:$0xff]  ;;  %v48_v43 = vld [vmem:[#allocation2 + $0x8] sm:$0xff]  ;;  %v276_v45 = vld [vmem:[#allocation5 + $0x4] sm:$0xf0]  ;;  %s379_s24 = smov [#allocation7]   ;;  %s197_s28 = sshll.u32 %s424_s3, 4  ;;  %s198_s28 = int_to_ptr.hbm [resolvable:$true] %s197_s28 }
  0x17   :  { %160 = vmatpush.bf16.xpose.msra.mxu0 %v262_v10  ;;  %v275_v46 = vld [vmem:[#allocation5 + $0x4] sm:$0xf]  ;;  %v215_v47 = vld [vmem:[#allocation5 + $0x8] sm:$0xf0]  ;;  %v49_v48 = vunpack.c.l.bf16 %v47_v42  ;;  %v51_v49 = vunpack.c.l.bf16 %v48_v43  ;;  %v214_v50 = vor.u32 %v276_v45, %v213_v44  ;;  %v50_v51 = vunpack.c.h.bf16 %v47_v42  ;;  %v296_v60 = vld [vmem:[%s423_s2] ss:$0 sm:$0xff] }
  0x18   :  { %174 = vmatpush.bf16.xpose.msra.mxu1 %v266_v11  ;;  %v52_v52 = vunpack.c.h.bf16 %v48_v43  ;;  %v218_v53 = vor.u32 %v275_v46, %v215_v47  ;;  %s195_s25 = sshll.u32 %s379_s24, 4  ;;  %s196_s25 = int_to_ptr.vmem [resolvable:$true] %s195_s25 }
  0x19   :  { %v53_v54 = vmax.f32 %v49_v48, 0.0  ;;  %v55_v55 = vmax.f32 %v51_v49, 0.0  ;;  %v54_v56 = vmax.f32 %v50_v51, 0.0 }
  0x1a   :  { %v56_v57 = vmax.f32 %v52_v52, 0.0 }
  0x1b   :  { %v57_v58 = vpack.c.bf16 %v55_v55, %v53_v54 }
  0x1c   :  { %v58_v59 = vpack.c.bf16 %v56_v57, %v54_v56 }
  0x1f   :  { %161 = vmatpush.bf16.xpose.msra.mxu0 %v254_v16 }
  0x20   :  { %175 = vmatpush.bf16.xpose.msra.mxu1 %v258_v17 }
  0x27   :  { %162 = vmatpush.bf16.xpose.msra.mxu0 %v246_v22 }
  0x28   :  { %176 = vmatpush.bf16.xpose.msra.mxu1 %v250_v23 }
  0x2f   :  { %163 = vmatpush.bf16.xpose.msra.mxu0 %v238_v28 }
  0x30   :  { %177 = vmatpush.bf16.xpose.msra.mxu1 %v242_v29 }
  0x37   :  { %164 = vmatpush.bf16.xpose.msra.mxu0 %v230_v34 }
  0x38   :  { %178 = vmatpush.bf16.xpose.msra.mxu1 %v234_v35 }
  0x3f   :  { %165 = vmatpush.bf16.xpose.msra.mxu0 %v222_v40 }
  0x40   :  { %179 = vmatpush.bf16.xpose.msra.mxu1 %v226_v41 }
  0x47   :  { %166 = vmatpush.bf16.xpose.msra.mxu0 %v214_v50 }
  0x48   :  { %180 = vmatpush.bf16.xpose.msra.mxu1 %v218_v53 }
  0x4e   :  { %167 = vmatmul.bf16.vlgmr.msra.gmra.mxu0 %v57_v58 }
  0x4f   :  { %181 = vmatmul.bf16.vlgmr.msra.gmra.mxu1 %v58_v59 }
  0xcb   :  { %v168_v61 = vpop.f32.mrf.mxu0 }
  0xcc   :  { %v169_v62 = vadd.f32 %v296_v60, %v168_v61  ;;  %v182_v63 = vpop.f32.mrf.mxu1 }
  0xce   :  { %v183_v0 = vadd.f32 %v182_v63, %v169_v62 }
  0xd0   :  { %v187_v1 = vmax.f32 %v183_v0, 0.0 }
  0xd2   :  { %189 = vst [vmem:[#allocation7] sm:$0xff] %v187_v1 }
  0xd3   :  { %v170_v2 = vpop.f32.mrf.mxu0 }
  0xd4   :  { %v171_v3 = vadd.f32 %v296_v60, %v170_v2  ;;  %v184_v4 = vpop.f32.mrf.mxu1 }
  0xd6   :  { %v185_v5 = vadd.f32 %v184_v4, %v171_v3 }
  0xd8   :  { %v188_v6 = vmax.f32 %v185_v5, 0.0 }
  0xda   :  { %190 = vst [vmem:[#allocation7 + $0x8] sm:$0xff] %v188_v6 }
  0xdb   :  { %203 = dma.vmem_to_hbm [thread:$0]  %s196_s25, 256, %s198_s28, [#allocation4], %s376_s20, %s376_s20, %s377_s21  }
  0xdc   :  { %373 = dma.done.wait [#allocation4], 256  }
  0xdd   :  { %374 = vsyncadd [#allocation4], 4294967040 }
  0xde   :  { %208 = vsyncpa [#allocation3], 1 }
  0xdf   :  { %209 = vsyncpa [#allocation6], 1 }
  0xe0   :  { %210 = vsyncpa [#allocation4], 1 }

</bundles_post_ra>
